<compile_context>
chip_gen: v7x
topology: tpu7x:2x2x1
jax: 0.10.0
libtpu: 0.0.40
codegen_flags: <defaults>
</compile_context>

<pallas_src>
import jax
import jax.numpy as jnp
from jax import lax
from jax.experimental import pallas as pl
from jax.experimental.pallas import tpu as pltpu


def _round_up(x, m):
    return ((x + m - 1) // m) * m


def _linear_kernel(x_ref, w_ref, b_ref, o_ref):
    # x_ref: (TB, D) VMEM   w_ref: (1, D) VMEM   b_ref: (1, 1) SMEM
    # o_ref: (1, TB) VMEM  (lane-dense output tile)
    acc = lax.dot_general(
        w_ref[...], x_ref[...],
        dimension_numbers=(((1,), (1,)), ((), ())),   # contract over D -> (1, TB)
        preferred_element_type=jnp.float32,
    )
    o_ref[...] = (acc + b_ref[0, 0]).astype(o_ref.dtype)


def linear_regression_forward(x, weight, bias,
                              *, x_vmem_budget_bytes=40 * 1024 * 1024):
    """x: (B, D) f32; weight: (1, D) f32; bias: (1,) f32 -> (B, 1) f32."""
    B, D = x.shape
    itemsize = jnp.dtype(x.dtype).itemsize

    # --- choose batch tile TB ------------------------------------------------
    # Dominant VMEM consumer is the double-buffered x tile: 2 * TB * D * bytes.
    tb = x_vmem_budget_bytes // max(1, 2 * D * itemsize)
    tb = max(128, min(4096, (tb // 128) * 128))       # multiple of 128 lanes

    b128 = _round_up(B, 128)                          # minimal lane-aligned batch
    tb = min(tb, b128)                                # don't over-pad tiny batches
    n_tiles = pl.cdiv(b128, tb)
    # Re-balance TB across tiles so padding overshoot is < 128 rows
    # (e.g. B=5000: naive tb=4096 -> pad to 8192; rebalanced tb=2560 -> 5120).
    tb = _round_up(pl.cdiv(b128, n_tiles), 128)

    B_pad = n_tiles * tb
    if B_pad != B:
        x = jnp.pad(x, ((0, B_pad - B), (0, 0)))      # padded rows sliced off below

    bias2 = bias.reshape(1, 1).astype(jnp.float32)    # scalar -> SMEM

    cost = pl.CostEstimate(
        flops=2 * B_pad * D,
        transcendentals=0,
        bytes_accessed=(B_pad * D + D + 1 + B_pad) * itemsize,
    )

    out_row = pl.pallas_call(
        _linear_kernel,
        out_shape=jax.ShapeDtypeStruct((1, B_pad), x.dtype),
        grid_spec=pltpu.PrefetchScalarGridSpec(
            num_scalar_prefetch=0,
            grid=(n_tiles,),
            in_specs=[
                pl.BlockSpec((tb, D), lambda i: (i, 0)),            # x tile streams
                pl.BlockSpec((1, D), lambda i: (0, 0)),             # W stays resident
                pl.BlockSpec(memory_space=pltpu.MemorySpace.SMEM),  # bias scalar
            ],
            out_specs=pl.BlockSpec((1, tb), lambda i: (0, i)),      # lane-dense tile
        ),
        compiler_params=pltpu.CompilerParams(
            dimension_semantics=("parallel",),        # megacore split on v7x
            vmem_limit_bytes=48 * 1024 * 1024,
        ),
        cost_estimate=cost,
    )(x, weight, bias2)

    # (1, B_pad) -> (B, 1), dropping padded rows. Glue reshape in plain JAX.
    return out_row.reshape(B_pad, 1)[:B]


if __name__ == "__main__":
    key = jax.random.PRNGKey(0)
    k_x, k_w, k_b = jax.random.split(key, 3)

    batch, input_dim = 8, 32

    # Deterministic synthetic parameters (nn.Linear(input_dim, 1) shapes).
    x = jax.random.normal(k_x, (batch, input_dim), dtype=jnp.float32)
    weight = jax.random.normal(k_w, (1, input_dim), dtype=jnp.float32) * 0.1
    bias = jax.random.normal(k_b, (1,), dtype=jnp.float32) * 0.1

    out = linear_regression_forward(x, weight, bias)
    out = jax.block_until_ready(out)

    # Reference check against plain JAX (same math as torch nn.Linear).
    ref = x @ weight.T + bias
    assert out.shape == (batch, 1)
    assert jnp.allclose(out, ref, atol=1e-4, rtol=1e-4)

    print("KERNEL_OK")
</pallas_src>

<mosaic_0001>
module attributes {stable_mosaic.version = 11 : i64} {
  func.func @_linear_kernel(%arg0: i32, %arg1: memref<128x32xf32, #tpu.memory_space<vmem>>, %arg2: memref<1x32xf32, #tpu.memory_space<vmem>>, %arg3: memref<1x1xf32, #tpu.memory_space<smem>>, %arg4: memref<1x128xf32, #tpu.memory_space<vmem>>) attributes {dimension_semantics = [#tpu.dimension_semantics<parallel>], iteration_bounds = array<i64: 1>, scalar_prefetch = 0 : i64, scratch_operands = 0 : i64, tpu.core_type = #tpu.core_type<tc>, window_params = [{transform_indices = @transform_0, window_bounds = array<i64: 128, 32>}, {pipeline_mode = #tpu.pipeline_mode<synchronous>, transform_indices = @transform_1, window_bounds = array<i64: 1, 32>}, {transform_indices = @transform_2, window_bounds = array<i64: 1, 1>}, {transform_indices = @transform_3, window_bounds = array<i64: 1, 128>}]} {
    %c0 = arith.constant 0 : index
    %c0_0 = arith.constant 0 : index
    %0 = vector.load %arg2[%c0, %c0_0] : memref<1x32xf32, #tpu.memory_space<vmem>>, vector<1x32xf32>
    %c0_1 = arith.constant 0 : index
    %c0_2 = arith.constant 0 : index
    %1 = vector.load %arg1[%c0_1, %c0_2] : memref<128x32xf32, #tpu.memory_space<vmem>>, vector<128x32xf32>
    %cst = arith.constant dense<0.000000e+00> : vector<1x128xf32>
    %2 = tpu.matmul %0, %1, %cst {dimension_numbers = #tpu.dot_dimension_numbers<[1], [1], [0], [0], [0, 0, 1, 0], [], []>} : vector<1x32xf32>, vector<128x32xf32>, vector<1x128xf32> -> vector<1x128xf32>
    %c0_3 = arith.constant 0 : index
    %c0_4 = arith.constant 0 : index
    %3 = memref.load %arg3[%c0_3, %c0_4] : memref<1x1xf32, #tpu.memory_space<smem>>
    %4 = vector.broadcast %3 : f32 to vector<1x128xf32>
    %5 = arith.addf %2, %4 : vector<1x128xf32>
    %c0_5 = arith.constant 0 : index
    %c0_6 = arith.constant 0 : index
    %6 = vector.load %arg4[%c0_5, %c0_6] : memref<1x128xf32, #tpu.memory_space<vmem>>, vector<1x128xf32>
    tpu.vector_store %arg4[%c0_5, %c0_6], %5 {strides = array<i32>} : memref<1x128xf32, #tpu.memory_space<vmem>>, vector<1x128xf32>,
    return
  }
  func.func @transform_0(%arg0: i32) -> (i32, i32) {
    %c0_i32 = arith.constant 0 : i32
    %c0_i32_0 = arith.constant 0 : i32
    return %arg0, %c0_i32 : i32, i32
  }
  func.func @transform_1(%arg0: i32) -> (i32, i32) {
    %c0_i32 = arith.constant 0 : i32
    %c0_i32_0 = arith.constant 0 : i32
    %c0_i32_1 = arith.constant 0 : i32
    return %c0_i32, %c0_i32_0 : i32, i32
  }
  func.func @transform_2(%arg0: i32) -> (i32, i32) {
    %c0_i32 = arith.constant 0 : i32
    %c0_i32_0 = arith.constant 0 : i32
    %c0_i32_1 = arith.constant 0 : i32
    return %c0_i32, %c0_i32_0 : i32, i32
  }
  func.func @transform_3(%arg0: i32) -> (i32, i32) {
    %c0_i32 = arith.constant 0 : i32
    %c0_i32_0 = arith.constant 0 : i32
    return %c0_i32, %arg0 : i32, i32
  }
}

</mosaic_0001>

<bundles_post_ra>
// kernel: tpu_custom_call.1
= control target key start
LH: loop header
LB: loop body
LE: loop exit
PB: predicated region body
PF: predicated region fallthrough
CT: control target
= control target key end

     0   :  { %vm35_vm0 = vcmask 261120   ;;  %v301_v2 = vmov 0.0|0.0   ;;  %vm302_vm2 = vmmov 0   ;;  %v303_v5 = vmov 0.0   ;;  %s414_s0 = inlined_call_operand.vmem [shape: f32[128,32], index: 0, kind: input, shape index: {}]   ;;  %s415_s1 = inlined_call_operand.vmem [shape: f32[1,32], index: 1, kind: input, shape index: {}]   ;;  %s416_s2 = inlined_call_operand.<no memory space> [shape: f32[1,1], index: 2, kind: input, shape index: {}]   ;;  %s417_s3 = inlined_call_operand.hbm [shape: f32[1,128], index: 3, kind: output, shape index: {}]  }
   0x1   :  { %v17_v0 = vld [vmem:[%s414_s0] sm:$0xff]  ;;  %v18_v1 = vld [vmem:[%s414_s0 + $0x8] sm:$0xff]  ;;  %241 = vmatprep.subr.bf16.mxu0 %v301_v2  ;;  %vm333_vm1 = vmpackc.low %vm35_vm0, %vm35_vm0  ;;  %238 = vmatprep.mubr.msk.f32.mxu0 %vm302_vm2, %v303_v5 }
   0x2   :  { %v242_v3 = vpack.c.bf16 %v18_v1, %v17_v0  ;;  %v19_v6 = vld [vmem:[%s414_s0 + $0x10] sm:$0xff]  ;;  %v20_v7 = vld [vmem:[%s414_s0 + $0x18] sm:$0xff] }
   0x4   :  { %244 = vmatpush3.bf16.xpose.msk.msra.mxu0 %vm333_vm1, %v242_v3 }
   0x5   :  { %245 = vmatprep.subr.bf16.mxu0 %v301_v2 }
   0x6   :  { %9 = vsyncpa [#allocation4], 0  ;;  %v246_v8 = vpack.c.bf16 %v20_v7, %v19_v6  ;;  %v21_v9 = vld [vmem:[%s414_s0 + $0x20] sm:$0xff]  ;;  %v22_v10 = vld [vmem:[%s414_s0 + $0x28] sm:$0xff]  ;;  %v34_v28 = vstv %s416_s2  ;;  %s304_s21 = smov [#allocation3]  }
   0x7   :  { %v250_v11 = vpack.c.bf16 %v22_v10, %v21_v9  ;;  %v23_v12 = vld [vmem:[%s414_s0 + $0x30] sm:$0xff]  ;;  %v24_v13 = vld [vmem:[%s414_s0 + $0x38] sm:$0xff]  ;;  %v25_v15 = vld [vmem:[%s414_s0 + $0x40] sm:$0xff]  ;;  %s164_s22 = sshll.u32 %s304_s21, 4  ;;  %s165_s22 = int_to_ptr.vmem [resolvable:$true] %s164_s22 }
   0x8   :  { %v254_v14 = vpack.c.bf16 %v24_v13, %v23_v12  ;;  %v26_v16 = vld [vmem:[%s414_s0 + $0x48] sm:$0xff]  ;;  %v27_v18 = vld [vmem:[%s414_s0 + $0x50] sm:$0xff]  ;;  %v28_v19 = vld [vmem:[%s414_s0 + $0x58] sm:$0xff]  ;;  %s281_s23 = scalar_lea.vmem %s165_s22, 32  ;;  %p282_p1 = scmp.lt.s32.totalorder %s165_s22, %s165_s22 }
   0x9   :  { %v258_v17 = vpack.c.bf16 %v26_v16, %v25_v15  ;;  %v262_v20 = vpack.c.bf16 %v28_v19, %v27_v18  ;;  %v29_v21 = vld [vmem:[%s414_s0 + $0x60] sm:$0xff]  ;;  %v30_v22 = vld [vmem:[%s414_s0 + $0x68] sm:$0xff]  ;;  %v31_v24 = vld [vmem:[%s414_s0 + $0x70] sm:$0xff] }
   0xa   :  { %v266_v23 = vpack.c.bf16 %v30_v22, %v29_v21  ;;  %v32_v25 = vld [vmem:[%s414_s0 + $0x78] sm:$0xff]  ;;  %v16_v27 = vld [vmem:[%s415_s1] sm:$0x1]  ;;  %s277_s0 = scalar_lea.vmem %s165_s22, 16 }
   0xb   :  { %v270_v26 = vpack.c.bf16 %v32_v25, %v31_v24  ;;  %p278_p0 = scmp.ne.s32.totalorder %s165_s22, %s277_s0  ;;  %p283_p2 = scmp.lt.s32.totalorder %s281_s23, %s277_s0 }
   0xc   :  { %248 = vmatpush3.bf16.xpose.msk.msra.mxu0 %vm333_vm1, %v246_v8 }
   0xd   :  { %249 = vmatprep.subr.bf16.mxu0 %v301_v2  ;;  %p284_p3 = por %p283_p2, %p282_p1 }
   0xf   :  { %p285_p4 = pnand %p284_p3, %p278_p0 }
  0x14   :  { %252 = vmatpush3.bf16.xpose.msk.msra.mxu0 %vm333_vm1, %v250_v11 }
  0x15   :  { %253 = vmatprep.subr.bf16.mxu0 %v301_v2 }
  0x1c   :  { %256 = vmatpush3.bf16.xpose.msk.msra.mxu0 %vm333_vm1, %v254_v14 }
  0x1d   :  { %257 = vmatprep.subr.bf16.mxu0 %v301_v2 }
  0x24   :  { %260 = vmatpush3.bf16.xpose.msk.msra.mxu0 %vm333_vm1, %v258_v17 }
  0x25   :  { %261 = vmatprep.subr.bf16.mxu0 %v301_v2 }
  0x2c   :  { %264 = vmatpush3.bf16.xpose.msk.msra.mxu0 %vm333_vm1, %v262_v20 }
  0x2d   :  { %265 = vmatprep.subr.bf16.mxu0 %v301_v2 }
  0x34   :  { %268 = vmatpush3.bf16.xpose.msk.msra.mxu0 %vm333_vm1, %v266_v23 }
  0x35   :  { %269 = vmatprep.subr.bf16.mxu0 %v301_v2 }
  0x3c   :  { %272 = vmatpush3.bf16.xpose.msk.msra.mxu0 %vm333_vm1, %v270_v26 }
  0x43   :  { %239 = vmatmul.mubr.msk.f32.vlgmr.msra.gmra.mrb[0].mxu0 %vm35_vm0, %v16_v27 }
 0x116   :  { %v153_v29 = vpop.f32.mrb[0].mxu0 }
 0x117   :  { %v154_v30 = vadd.f32 %v153_v29, %v34_v28  ;;  %v240_v31 = vpop.f32.mrb[1].mxu0 }
 0x119   :  { %157 = vst [vmem:[#allocation3] sm:$0x1] %v154_v30 }
 0x11a   :  { %288 = shalt.err (!%p285_p4)
}
 0x11b   :  { %s289_s25 = scalar_lea.hbm %s417_s3, 16 }
 0x11c   :  { %p290_p5 = scmp.ne.s32.totalorder %s417_s3, %s289_s25  ;;  %p293_p6 = scmp.lt.u32.totalorder %s289_s25, %s417_s3 }
 0x11e   :  { %p295_p7 = pnand %p293_p6, %p290_p5 }
 0x120   :  { %298 = shalt.err (!%p295_p7)
}
 0x121   :  { %167 = dma.vmem_to_hbm [thread:$0]  %s165_s22, 16, %s417_s3, [#allocation4]  }
 0x122   :  { %299 = dma.done.wait [#allocation4], 16  }
 0x123   :  { %300 = vsyncadd [#allocation4], 4294967280 }
 0x124   :  { %171 = vsyncpa [#allocation4], 1 }

</bundles_post_ra>
